<compile_context>
chip_gen: v6e
topology: v6e:2x2x1
jax: 0.10.0
libtpu: 0.0.40
codegen_flags: <defaults>
</compile_context>

<pallas_src>
import math
from functools import partial

import jax
import jax.numpy as jnp
from jax.experimental import pallas as pl
from jax.experimental.pallas import tpu as pltpu


def inv_softplus(bias: float) -> float:
    """Inverse softplus: log(clamp(expm1(bias), 1e-6)). Matches the PyTorch helper."""
    return math.log(max(math.expm1(bias), 1e-6))


def _biased_softplus_kernel(x_ref, o_ref, *, bias_shift: float, min_val: float):
    x = x_ref[...].astype(jnp.float32)
    z = x + jnp.float32(bias_shift)
    # Numerically stable softplus: max(z, 0) + log1p(exp(-|z|)).
    # Differs from PyTorch's threshold-20 branch by < 1e-9.
    sp = jnp.maximum(z, 0.0) + jnp.log1p(jnp.exp(-jnp.abs(z)))
    o_ref[...] = (sp + jnp.float32(min_val)).astype(o_ref.dtype)


def biased_softplus_forward(x: jax.Array, bias: float, min_val: float = 0.01) -> jax.Array:
    """Apply biased_softplus elementwise via a Pallas TPU kernel."""
    bias_shift = inv_softplus(bias - min_val)

    orig_shape = x.shape
    orig_dtype = x.dtype
    n = x.size
    if n == 0:
        return x

    itemsize = jnp.dtype(orig_dtype).itemsize
    # Sublane packing: 8 rows f32, 16 bf16, 32 int8/fp8.
    pack = max(8, 32 // max(itemsize, 1))

    kernel = partial(_biased_softplus_kernel, bias_shift=bias_shift, min_val=min_val)

    # ---- Fast path: small, 128-aligned inputs -> single full-array VMEM block,
    # no grid, no padding, no final slice. ------------------------------------
    SMALL_ELEMS = 1 << 18  # 256K elems; above this a pipelined grid (and both TCs on v7x) wins.
    if n <= SMALL_ELEMS and n % 128 == 0:
        W = 128
        for cand in (1024, 512, 256, 128):
            if n % cand == 0 and (n // cand) % pack == 0:
                W = cand
                break
        x2d = x.reshape(n // W, W)
        out2d = pl.pallas_call(
            kernel,
            out_shape=jax.ShapeDtypeStruct(x2d.shape, orig_dtype),
        )(x2d)
        return out2d.reshape(orig_shape)

    # ---- General path: lane-dense (rows, W) slab, ~4 MiB dtype-aware blocks. -
    # Pick the widest W that divides n so the reshape is free (no pad / slice).
    W = 1024
    for cand in (1024, 512, 256, 128):
        if n % cand == 0:
            W = cand
            break
    padded = (n % W) != 0           # only true when n is not 128-aligned
    rows = pl.cdiv(n, W)

    x_flat = jnp.ravel(x)
    if padded:
        x_flat = jnp.pad(x_flat, (0, rows * W - n))
    x2d = x_flat.reshape(rows, W)

    # ~4 MiB per block (1024 rows for f32 @ W=1024; 2048 for bf16). Ragged last
    # block is masked by Pallas -- no row padding needed.
    target_block_rows = max(pack, (4 << 20) // (W * itemsize))
    block_rows = min(rows, target_block_rows)
    grid = (pl.cdiv(rows, block_rows),)

    out2d = pl.pallas_call(
        kernel,
        out_shape=jax.ShapeDtypeStruct((rows, W), orig_dtype),
        grid_spec=pl.GridSpec(
            grid=grid,
            in_specs=[pl.BlockSpec((block_rows, W), lambda i: (i, 0))],
            out_specs=pl.BlockSpec((block_rows, W), lambda i: (i, 0)),
        ),
        compiler_params=pltpu.CompilerParams(
            dimension_semantics=("parallel",),   # megacore sharding on v7x
            vmem_limit_bytes=48 << 20,           # 4x 4 MiB pipeline buffers + headroom, v7x-safe
        ),
    )(x2d)

    out_flat = out2d.reshape(-1)
    if padded:
        out_flat = out_flat[:n]
    return out_flat.reshape(orig_shape)


def _reference(x, bias, min_val=0.01):
    bias_shift = inv_softplus(bias - min_val)
    return jax.nn.softplus(x + bias_shift) + min_val


if __name__ == "__main__":
    key = jax.random.PRNGKey(0)
    # Module constructor args (deterministic, in-script).
    bias = 1.0
    min_val = 0.01

    # Primary small input consistent with the module (elementwise op).
    x = jax.random.normal(key, (2, 4, 16, 16), dtype=jnp.float32)
    out = jax.block_until_ready(biased_softplus_forward(x, bias, min_val))
    ref = _reference(x, bias, min_val)
    assert out.shape == x.shape and out.dtype == x.dtype
    assert jnp.allclose(out, ref, atol=1e-5, rtol=1e-5)

    # Exercise the gridded path (128-aligned, > fast-path cutoff) and the
    # padded fallback (non-128-aligned) once each.
    for shape in ((8, 256, 160), (3, 7, 101)):
        k2 = jax.random.fold_in(key, hash(shape) & 0x7FFFFFFF)
        x2 = jax.random.normal(k2, shape, dtype=jnp.float32)
        o2 = jax.block_until_ready(biased_softplus_forward(x2, bias, min_val))
        assert o2.shape == x2.shape
        assert jnp.allclose(o2, _reference(x2, bias, min_val), atol=1e-5, rtol=1e-5)

    print("KERNEL_OK")
</pallas_src>

<mosaic_0001>
module attributes {stable_mosaic.version = 11 : i64} {
  func.func @_biased_softplus_kernel(%arg0: memref<8x256xf32, #tpu.memory_space<vmem>>, %arg1: memref<8x256xf32, #tpu.memory_space<vmem>>) attributes {dimension_semantics = [], scalar_prefetch = 0 : i64, scratch_operands = 0 : i64, tpu.core_type = #tpu.core_type<tc>} {
    %c0 = arith.constant 0 : index
    %c0_0 = arith.constant 0 : index
    %0 = vector.load %arg0[%c0, %c0_0] : memref<8x256xf32, #tpu.memory_space<vmem>>, vector<8x256xf32>
    %cst = arith.constant 0.525458694 : f32
    %1 = vector.broadcast %cst : f32 to vector<8x256xf32>
    %2 = arith.addf %0, %1 : vector<8x256xf32>
    %cst_1 = arith.constant 0.000000e+00 : f32
    %3 = vector.broadcast %cst_1 : f32 to vector<8x256xf32>
    %4 = arith.maximumf %2, %3 : vector<8x256xf32>
    %5 = math.absf %2 : vector<8x256xf32>
    %cst_2 = arith.constant 0.000000e+00 : f32
    %6 = vector.broadcast %cst_2 : f32 to vector<8x256xf32>
    %7 = arith.subf %6, %5 : vector<8x256xf32>
    %8 = math.exp %7 : vector<8x256xf32>
    %9 = math.log1p %8 : vector<8x256xf32>
    %10 = arith.addf %4, %9 : vector<8x256xf32>
    %cst_3 = arith.constant 0.00999999977 : f32
    %11 = vector.broadcast %cst_3 : f32 to vector<8x256xf32>
    %12 = arith.addf %10, %11 : vector<8x256xf32>
    %c0_4 = arith.constant 0 : index
    %c0_5 = arith.constant 0 : index
    %13 = vector.load %arg1[%c0_4, %c0_5] : memref<8x256xf32, #tpu.memory_space<vmem>>, vector<8x256xf32>
    tpu.vector_store %arg1[%c0_4, %c0_5], %12 {strides = array<i32>} : memref<8x256xf32, #tpu.memory_space<vmem>>, vector<8x256xf32>,
    return
  }
}

</mosaic_0001>

<bundles_post_ra>
// kernel: tpu_custom_call.1
= control target key start
LH: loop header
LB: loop body
LE: loop exit
PB: predicated region body
PF: predicated region fallthrough
CT: control target
= control target key end

     0   :  { %6 = vsyncpa [#allocation3], 0  ;;  %s146_s0 = inlined_call_operand.hbm [shape: f32[8,256], index: 0, kind: input, shape index: {}]   ;;  %s147_s1 = inlined_call_operand.hbm [shape: f32[8,256], index: 1, kind: output, shape index: {}]  }
   0x1   :  { %7 = vsyncpa [#allocation4], 0  ;;  %s128_s6 = smov [#allocation2]  }
   0x2   :  { %s14_s7 = sshll.u32 %s128_s6, 4  ;;  %s15_s7 = int_to_ptr.vmem [resolvable:$true] %s14_s7 }
   0x3   :  { %s92_s8 = scalar_lea.vmem %s15_s7, 256  ;;  %p97_p1 = scmp.lt.s32.totalorder %s15_s7, %s15_s7 }
   0x4   :  { %p93_p0 = scmp.ne.s32.totalorder %s15_s7, %s92_s8  ;;  %p98_p2 = scmp.lt.s32.totalorder %s92_s8, %s92_s8 }
   0x6   :  { %p99_p3 = por %p98_p2, %p97_p1 }
   0x8   :  { %p100_p4 = pnand %p99_p3, %p93_p0 }
   0xa   :  { %103 = shalt.err (!%p100_p4)
}
   0xb   :  { %17 = dma.hbm_to_vmem [thread:$0]  %s146_s0, 256, %s15_s7, [#allocation3]  }
   0xc   :  { %124 = dma.done.wait [#allocation3], 256  }
   0xd   :  { %125 = vsyncadd [#allocation3], 4294967040  ;;  %v21_v0 = vld [vmem:[#allocation2] sm:$0xff]  ;;  %v22_v1 = vld [vmem:[#allocation2 + $0x8] sm:$0xff]  ;;  %s129_s0 = smov [#allocation5]  }
   0xe   :  { %v23_v2 = vadd.f32 0.5254587, %v21_v0  ;;  %v24_v3 = vadd.f32 0.5254587, %v22_v1  ;;  %s65_s11 = sshll.u32 %s129_s0, 4  ;;  %s66_s11 = int_to_ptr.vmem [resolvable:$true] %s65_s11 }
   0xf   :  { %s104_s12 = scalar_lea.vmem %s66_s11, 256  ;;  %p109_p6 = scmp.lt.s32.totalorder %s66_s11, %s66_s11 }
  0x10   :  { %v27_v4 = vand.u32 2147483647, %v23_v2  ;;  %v28_v5 = vand.u32 2147483647, %v24_v3  ;;  %v25_v22 = vmax.f32 %v23_v2, 0.0  ;;  %v26_v26 = vmax.f32 %v24_v3, 0.0  ;;  %p105_p5 = scmp.ne.s32.totalorder %s66_s11, %s104_s12  ;;  %p110_p7 = scmp.lt.s32.totalorder %s104_s12, %s104_s12 }
  0x12   :  { %v29_v6 = vsub.f32 0.0, %v27_v4  ;;  %v30_v7 = vsub.f32 0.0, %v28_v5  ;;  %p111_p8 = por %p110_p7, %p109_p6 }
  0x14   :  { %v31_v8 = vmul.f32 1.442695, %v29_v6  ;;  %v33_v9 = vmul.f32 1.442695, %v30_v7  ;;  %p112_p9 = pnand %p111_p8, %p105_p5 }
  0x16   :  { %76 = vpow2.f32 %v31_v8 }
  0x17   :  { %78 = vpow2.f32 %v33_v9 }
  0x23   :  { %v77_v10 = vpop.eup %76 }
  0x24   :  { %v79_v11 = vpop.eup %78  ;;  %v35_v12 = vadd.f32 1.0, %v77_v10  ;;  %v38_v14 = vmul.f32 -0.5, %v77_v10  ;;  %v41_v17 = vand.u32 2147483647, %v77_v10 }
  0x25   :  { %v44_v13 = vadd.f32 1.0, %v79_v11  ;;  %v47_v15 = vmul.f32 -0.5, %v79_v11  ;;  %v50_v19 = vand.u32 2147483647, %v79_v11 }
  0x26   :  { %80 = vlog2.f32 %v35_v12  ;;  %v39_v16 = vadd.f32 1.0, %v38_v14  ;;  %vm42_vm0 = vcmp.lt.f32.partialorder %v41_v17, 0.0004427343 }
  0x27   :  { %82 = vlog2.f32 %v44_v13  ;;  %v48_v18 = vadd.f32 1.0, %v47_v15  ;;  %vm51_vm1 = vcmp.lt.f32.partialorder %v50_v19, 0.0004427343 }
  0x28   :  { %v40_v20 = vmul.f32 %v77_v10, %v39_v16 }
  0x29   :  { %v49_v23 = vmul.f32 %v79_v11, %v48_v18 }
  0x33   :  { %v81_v21 = vpop.eup %80 }
  0x34   :  { %v83_v24 = vpop.eup %82  ;;  %v37_v25 = vmul.f32 0.6931472, %v81_v21 }
  0x35   :  { %v46_v27 = vmul.f32 0.6931472, %v83_v24 }
  0x36   :  { %v43_v28 = vsel %vm42_vm0, %v40_v20, %v37_v25 }
  0x37   :  { %v53_v29 = vadd.f32 %v43_v28, %v25_v22  ;;  %v52_v30 = vsel %vm51_vm1, %v49_v23, %v46_v27 }
  0x38   :  { %v54_v31 = vadd.f32 %v52_v30, %v26_v26 }
  0x39   :  { %v55_v32 = vadd.f32 0.01, %v53_v29 }
  0x3a   :  { %v56_v33 = vadd.f32 0.01, %v54_v31 }
  0x3b   :  { %57 = vst [vmem:[#allocation5] sm:$0xff] %v55_v32 }
  0x3c   :  { %58 = vst [vmem:[#allocation5 + $0x8] sm:$0xff] %v56_v33 }
  0x3d   :  { %115 = shalt.err (!%p112_p9)
}
  0x3e   :  { %68 = dma.vmem_to_hbm [thread:$0]  %s66_s11, 256, %s147_s1, [#allocation4]  }
  0x3f   :  { %126 = dma.done.wait [#allocation4], 256  }
  0x40   :  { %127 = vsyncadd [#allocation4], 4294967040 }
  0x41   :  { %72 = vsyncpa [#allocation3], 1 }
  0x42   :  { %73 = vsyncpa [#allocation4], 1 }

</bundles_post_ra>
